<compile_context>
chip_gen: v6e
topology: v6e:2x2x1
jax: 0.10.0
libtpu: 0.0.40
codegen_flags: <defaults>
</compile_context>

<pallas_src>
import jax
import jax.numpy as jnp
from jax.experimental import pallas as pl
from jax.experimental.pallas import tpu as pltpu


_SQRT_2_OVER_PI = 0.7978845608028654


def _gelu_tanh(x):
    # tanh-approximate GELU; tanh lowers to the otherwise-idle EUP slot.
    # TODO(synk): torch.nn.GELU() defaults to the exact erf form (max abs diff
    # ~1e-3 vs the tanh approx); tanh is used for guaranteed Mosaic lowering.
    return 0.5 * x * (1.0 + jnp.tanh(_SQRT_2_OVER_PI * (x + 0.044715 * x * x * x)))


def ffn_kernel(x_ref, w1_ref, b1_ref, w2_ref, b2_ref, o_ref, acc_ref):
    # One (row-tile, hidden-chunk) grid step of the fused FFN.
    #   x: (bm, C)   w1: (C, bh)   b1: (1, bh)   w2: (bh, C)   b2: (1, C)
    #   o: (bm, C)   acc: (bm, C) f32 scratch (persists across the hidden axis)
    hk = pl.program_id(1)

    @pl.when(hk == 0)
    def _():
        acc_ref[...] = jnp.zeros_like(acc_ref)

    # MXU takes bf16 inputs (cast right at the dot), accumulates in f32.
    x = x_ref[...].astype(w1_ref.dtype)
    h = jnp.dot(x, w1_ref[...], preferred_element_type=jnp.float32)
    h = h + b1_ref[...].astype(jnp.float32)        # f32 elementwise
    h = _gelu_tanh(h)                              # f32 elementwise + EUP tanh
    acc_ref[...] += jnp.dot(h.astype(w2_ref.dtype), w2_ref[...],
                            preferred_element_type=jnp.float32)

    @pl.when(hk == pl.num_programs(1) - 1)
    def _():
        out = acc_ref[...] + b2_ref[...].astype(jnp.float32)
        # TODO(synk): training-mode dropout would fuse here via pltpu.prng_seed +
        # pltpu.prng_random_bits on the (bm, C) tile; eval-mode dropout is identity.
        o_ref[...] = out.astype(o_ref.dtype)


def _round_up(n, m):
    return ((n + m - 1) // m) * m


def feedforward_forward(x, w1, b1, w2, b2, *, block_m=1024, block_h=512,
                        matmul_dtype=jnp.bfloat16):
    """x: (B,T,C); w1: (C,4C); b1: (1,4C); w2: (4C,C); b2: (1,C) -> (B,T,C).

    Weights are stored (in, out) — the transpose of torch.nn.Linear's (out, in) —
    so both GEMMs are plain `x @ W` on the MXU with no in-kernel transposes.
    """
    B, T, C = x.shape
    H = w1.shape[1]                       # 4*C
    M = B * T

    # Row tiling: pad M to a multiple of the row tile (pipeline stays alive,
    # tile size bounded); prefer >= 2 row tiles so the "parallel" axis shards
    # across both v7x TensorCores.
    bm = min(block_m, _round_up(M, 8))
    if M > 512 and _round_up(M, bm) // bm < 2:
        bm = _round_up(pl.cdiv(M, 2), 8)
    m_pad = _round_up(M, bm)
    grid_m = m_pad // bm

    # Hidden (reduction) tiling: stream w1/w2 in lane-dense chunks so the
    # (bm, 4C) intermediate never lives in full and weight DMAs pipeline.
    bh = block_h if H % block_h == 0 else H
    # TODO(synk): pad H instead of the bh=H fallback if a hidden size that is
    # not a multiple of block_h ever shows up at large scale.
    grid_h = H // bh

    x2 = x.reshape(M, C)                  # lane-dense 2-D view (layout plumbing)
    if m_pad != M:
        x2 = jnp.pad(x2, ((0, m_pad - M), (0, 0)))

    # bf16 weights: native MXU dtype on v6e/v7x (~2x matmul rate, half the
    # weight DMA bytes); accumulation stays f32 via preferred_element_type.
    w1c = w1.astype(matmul_dtype)
    w2c = w2.astype(matmul_dtype)

    nbytes = lambda a: int(a.size) * a.dtype.itemsize
    cost = pl.CostEstimate(
        flops=4 * M * C * H,                       # two GEMMs, 2*M*C*H each
        transcendentals=M * H,                     # tanh in GELU
        bytes_accessed=(nbytes(x2) + nbytes(w1c) + nbytes(w2c)
                        + nbytes(b1) + nbytes(b2) + m_pad * C * x.dtype.itemsize),
    )

    out2 = pl.pallas_call(
        ffn_kernel,
        out_shape=jax.ShapeDtypeStruct((m_pad, C), x.dtype),
        grid_spec=pltpu.PrefetchScalarGridSpec(
            num_scalar_prefetch=0,
            grid=(grid_m, grid_h),
            in_specs=[
                pl.BlockSpec((bm, C), lambda i, h: (i, 0)),   # rows; resident over h
                pl.BlockSpec((C, bh), lambda i, h: (0, h)),   # w1 chunk streams over h
                pl.BlockSpec((1, bh), lambda i, h: (0, h)),   # b1 chunk
                pl.BlockSpec((bh, C), lambda i, h: (h, 0)),   # w2 chunk streams over h
                pl.BlockSpec((1, C), lambda i, h: (0, 0)),    # b2: tiny, constant
            ],
            out_specs=pl.BlockSpec((bm, C), lambda i, h: (i, 0)),
            scratch_shapes=[pltpu.VMEM((bm, C), jnp.float32)],  # f32 accumulator
        ),
        compiler_params=pltpu.CompilerParams(
            dimension_semantics=("parallel", "arbitrary"),    # rows shard; h is reduction
        ),
        cost_estimate=cost,
    )(x2, w1c, b1, w2c, b2)

    if m_pad != M:
        out2 = out2[:M]
    return out2.reshape(B, T, C)


def feedforward_reference(x, w1, b1, w2, b2, *, matmul_dtype=jnp.bfloat16):
    """Pure-JAX reference mirroring the kernel's mixed-precision compute."""
    h = jnp.dot(x.astype(matmul_dtype), w1.astype(matmul_dtype),
                preferred_element_type=jnp.float32) + b1[0]
    h = _gelu_tanh(h)
    out = jnp.dot(h.astype(matmul_dtype), w2.astype(matmul_dtype),
                  preferred_element_type=jnp.float32) + b2[0]
    return out.astype(x.dtype)


if __name__ == "__main__":
    # Module hyper-params: n_embd lane-dense (multiple of 128), dropout=0 (eval).
    n_embd = 128
    hidden = 4 * n_embd                  # 512
    B, T = 2, 8

    key = jax.random.PRNGKey(0)
    kx, k1, kb1, k2, kb2 = jax.random.split(key, 5)
    x = jax.random.normal(kx, (B, T, n_embd), dtype=jnp.float32)

    # Deterministic "Linear" params (torch default U(-1/sqrt(fan_in), +1/sqrt(fan_in))),
    # weights stored as (in, out).
    bound1 = 1.0 / (n_embd ** 0.5)
    bound2 = 1.0 / (hidden ** 0.5)
    w1 = jax.random.uniform(k1, (n_embd, hidden), jnp.float32, -bound1, bound1)
    b1 = jax.random.uniform(kb1, (1, hidden), jnp.float32, -bound1, bound1)
    w2 = jax.random.uniform(k2, (hidden, n_embd), jnp.float32, -bound2, bound2)
    b2 = jax.random.uniform(kb2, (1, n_embd), jnp.float32, -bound2, bound2)

    out = feedforward_forward(x, w1, b1, w2, b2)
    out = jax.block_until_ready(out)

    ref = feedforward_reference(x, w1, b1, w2, b2)
    assert out.shape == (B, T, n_embd)
    assert jnp.allclose(out, ref, atol=5e-3, rtol=5e-3), "mismatch vs reference"

    print("KERNEL_OK")
</pallas_src>

<mosaic_0001>
module attributes {stable_mosaic.version = 11 : i64} {
  func.func @ffn_kernel(%arg0: i32, %arg1: i32, %arg2: memref<16x128xf32, #tpu.memory_space<vmem>>, %arg3: memref<128x512xbf16, #tpu.memory_space<vmem>>, %arg4: memref<1x512xf32, #tpu.memory_space<vmem>>, %arg5: memref<512x128xbf16, #tpu.memory_space<vmem>>, %arg6: memref<1x128xf32, #tpu.memory_space<vmem>>, %arg7: memref<16x128xf32, #tpu.memory_space<vmem>>, %arg8: memref<16x128xf32, #tpu.memory_space<vmem>>) attributes {dimension_semantics = [#tpu.dimension_semantics<parallel>, #tpu.dimension_semantics<arbitrary>], iteration_bounds = array<i64: 1, 1>, scalar_prefetch = 0 : i64, scratch_operands = 1 : i64, tpu.core_type = #tpu.core_type<tc>, window_params = [{transform_indices = @transform_0, window_bounds = array<i64: 16, 128>}, {transform_indices = @transform_1, window_bounds = array<i64: 128, 512>}, {transform_indices = @transform_2, window_bounds = array<i64: 1, 512>}, {transform_indices = @transform_3, window_bounds = array<i64: 512, 128>}, {pipeline_mode = #tpu.pipeline_mode<synchronous>, transform_indices = @transform_4, window_bounds = array<i64: 1, 128>}, {transform_indices = @transform_5, window_bounds = array<i64: 16, 128>}]} {
    %c0_i32 = arith.constant 0 : i32
    %0 = arith.cmpi eq, %arg1, %c0_i32 : i32
    %1 = arith.extui %0 : i1 to i32
    %c0_i32_0 = arith.constant 0 : i32
    %2 = arith.cmpi ne, %1, %c0_i32_0 : i32
    scf.if %2 {
      %cst_19 = arith.constant 0.000000e+00 : f32
      %32 = vector.broadcast %cst_19 : f32 to vector<16x128xf32>
      %c0_20 = arith.constant 0 : index
      %c0_21 = arith.constant 0 : index
      %33 = vector.load %arg8[%c0_20, %c0_21] : memref<16x128xf32, #tpu.memory_space<vmem>>, vector<16x128xf32>
      tpu.vector_store %arg8[%c0_20, %c0_21], %32 {strides = array<i32>} : memref<16x128xf32, #tpu.memory_space<vmem>>, vector<16x128xf32>,
    } else {
    }
    %c0 = arith.constant 0 : index
    %c0_1 = arith.constant 0 : index
    %3 = vector.load %arg2[%c0, %c0_1] : memref<16x128xf32, #tpu.memory_space<vmem>>, vector<16x128xf32>
    %4 = arith.truncf %3 : vector<16x128xf32> to vector<16x128xbf16>
    %c0_2 = arith.constant 0 : index
    %c0_3 = arith.constant 0 : index
    %5 = vector.load %arg3[%c0_2, %c0_3] : memref<128x512xbf16, #tpu.memory_space<vmem>>, vector<128x512xbf16>
    %cst = arith.constant dense<0.000000e+00> : vector<16x512xf32>
    %6 = tpu.matmul %4, %5, %cst {dimension_numbers = #tpu.dot_dimension_numbers<[1], [0], [0], [1], [0, 0, 1, 1], [], []>} : vector<16x128xbf16>, vector<128x512xbf16>, vector<16x512xf32> -> vector<16x512xf32>
    %c0_4 = arith.constant 0 : index
    %c0_5 = arith.constant 0 : index
    %7 = vector.load %arg4[%c0_4, %c0_5] : memref<1x512xf32, #tpu.memory_space<vmem>>, vector<1x512xf32>
    %8 = vector.broadcast %7 : vector<1x512xf32> to vector<16x512xf32>
    %9 = arith.addf %6, %8 : vector<16x512xf32>
    %cst_6 = arith.constant 5.000000e-01 : f32
    %10 = vector.broadcast %cst_6 : f32 to vector<16x512xf32>
    %11 = arith.mulf %10, %9 : vector<16x512xf32>
    %cst_7 = arith.constant 4.471500e-02 : f32
    %12 = vector.broadcast %cst_7 : f32 to vector<16x512xf32>
    %13 = arith.mulf %12, %9 : vector<16x512xf32>
    %14 = arith.mulf %13, %9 : vector<16x512xf32>
    %15 = arith.mulf %14, %9 : vector<16x512xf32>
    %16 = arith.addf %9, %15 : vector<16x512xf32>
    %cst_8 = arith.constant 0.797884583 : f32
    %17 = vector.broadcast %cst_8 : f32 to vector<16x512xf32>
    %18 = arith.mulf %17, %16 : vector<16x512xf32>
    %19 = math.tanh %18 : vector<16x512xf32>
    %cst_9 = arith.constant 1.000000e+00 : f32
    %20 = vector.broadcast %cst_9 : f32 to vector<16x512xf32>
    %21 = arith.addf %20, %19 : vector<16x512xf32>
    %22 = arith.mulf %11, %21 : vector<16x512xf32>
    %c0_10 = arith.constant 0 : index
    %c0_11 = arith.constant 0 : index
    %23 = vector.load %arg8[%c0_10, %c0_11] : memref<16x128xf32, #tpu.memory_space<vmem>>, vector<16x128xf32>
    %24 = arith.truncf %22 : vector<16x512xf32> to vector<16x512xbf16>
    %c0_12 = arith.constant 0 : index
    %c0_13 = arith.constant 0 : index
    %25 = vector.load %arg5[%c0_12, %c0_13] : memref<512x128xbf16, #tpu.memory_space<vmem>>, vector<512x128xbf16>
    %cst_14 = arith.constant dense<0.000000e+00> : vector<16x128xf32>
    %26 = tpu.matmul %24, %25, %cst_14 {dimension_numbers = #tpu.dot_dimension_numbers<[1], [0], [0], [1], [0, 0, 1, 1], [], []>} : vector<16x512xbf16>, vector<512x128xbf16>, vector<16x128xf32> -> vector<16x128xf32>
    %27 = arith.addf %23, %26 : vector<16x128xf32>
    %c0_15 = arith.constant 0 : index
    %c0_16 = arith.constant 0 : index
    %28 = vector.load %arg8[%c0_15, %c0_16] : memref<16x128xf32, #tpu.memory_space<vmem>>, vector<16x128xf32>
    tpu.vector_store %arg8[%c0_15, %c0_16], %27 {strides = array<i32>} : memref<16x128xf32, #tpu.memory_space<vmem>>, vector<16x128xf32>,
    %c0_i32_17 = arith.constant 0 : i32
    %29 = arith.cmpi eq, %arg1, %c0_i32_17 : i32
    %30 = arith.extui %29 : i1 to i32
    %c0_i32_18 = arith.constant 0 : i32
    %31 = arith.cmpi ne, %30, %c0_i32_18 : i32
    scf.if %31 {
      %c0_19 = arith.constant 0 : index
      %c0_20 = arith.constant 0 : index
      %32 = vector.load %arg8[%c0_19, %c0_20] : memref<16x128xf32, #tpu.memory_space<vmem>>, vector<16x128xf32>
      %c0_21 = arith.constant 0 : index
      %c0_22 = arith.constant 0 : index
      %33 = vector.load %arg6[%c0_21, %c0_22] : memref<1x128xf32, #tpu.memory_space<vmem>>, vector<1x128xf32>
      %34 = vector.broadcast %33 : vector<1x128xf32> to vector<16x128xf32>
      %35 = arith.addf %32, %34 : vector<16x128xf32>
      %c0_23 = arith.constant 0 : index
      %c0_24 = arith.constant 0 : index
      %36 = vector.load %arg7[%c0_23, %c0_24] : memref<16x128xf32, #tpu.memory_space<vmem>>, vector<16x128xf32>
      tpu.vector_store %arg7[%c0_23, %c0_24], %35 {strides = array<i32>} : memref<16x128xf32, #tpu.memory_space<vmem>>, vector<16x128xf32>,
    } else {
    }
    return
  }
  func.func @transform_0(%arg0: i32, %arg1: i32) -> (i32, i32) {
    %c0_i32 = arith.constant 0 : i32
    %c0_i32_0 = arith.constant 0 : i32
    return %arg0, %c0_i32 : i32, i32
  }
  func.func @transform_1(%arg0: i32, %arg1: i32) -> (i32, i32) {
    %c0_i32 = arith.constant 0 : i32
    %c0_i32_0 = arith.constant 0 : i32
    return %c0_i32, %arg1 : i32, i32
  }
  func.func @transform_2(%arg0: i32, %arg1: i32) -> (i32, i32) {
    %c0_i32 = arith.constant 0 : i32
    %c0_i32_0 = arith.constant 0 : i32
    return %c0_i32, %arg1 : i32, i32
  }
  func.func @transform_3(%arg0: i32, %arg1: i32) -> (i32, i32) {
    %c0_i32 = arith.constant 0 : i32
    %c0_i32_0 = arith.constant 0 : i32
    return %arg1, %c0_i32 : i32, i32
  }
  func.func @transform_4(%arg0: i32, %arg1: i32) -> (i32, i32) {
    %c0_i32 = arith.constant 0 : i32
    %c0_i32_0 = arith.constant 0 : i32
    %c0_i32_1 = arith.constant 0 : i32
    return %c0_i32, %c0_i32_0 : i32, i32
  }
  func.func @transform_5(%arg0: i32, %arg1: i32) -> (i32, i32) {
    %c0_i32 = arith.constant 0 : i32
    %c0_i32_0 = arith.constant 0 : i32
    return %arg0, %c0_i32 : i32, i32
  }
}

</mosaic_0001>

<bundles_post_ra>
// kernel: tpu_custom_call.1
= control target key start
LH: loop header
LB: loop body
LE: loop exit
PB: predicated region body
PF: predicated region fallthrough
CT: control target
= control target key end

     0   :  { %10 = vsyncpa [#allocation4], 0  ;;  %s1258_s0 = inlined_call_operand.hbm [shape: f32[16,128], index: 0, kind: input, shape index: {}]   ;;  %s1259_s1 = inlined_call_operand.hbm [shape: bf16[128,512], index: 1, kind: input, shape index: {}]   ;;  %s1260_s2 = inlined_call_operand.hbm [shape: f32[1,512], index: 2, kind: input, shape index: {}]   ;;  %s1261_s3 = inlined_call_operand.hbm [shape: bf16[512,128], index: 3, kind: input, shape index: {}]   ;;  %s1262_s4 = inlined_call_operand.vmem [shape: f32[1,128], index: 4, kind: input, shape index: {}]   ;;  %s1263_s5 = inlined_call_operand.hbm [shape: f32[16,128], index: 5, kind: output, shape index: {}]  }
   0x1   :  { %11 = vsyncpa [#allocation7], 0 }
   0x2   :  { %12 = vsyncpa [#allocation10], 0 }
   0x3   :  { %13 = vsyncpa [#allocation5], 0  ;;  %s1164_s18 = smov [#allocation6]  }
   0x4   :  { %s31_s19 = sshll.u32 %s1164_s18, 4  ;;  %s32_s19 = int_to_ptr.vmem [resolvable:$true] %s31_s19 }
   0x5   :  { %s1064_s20 = scalar_lea.vmem %s32_s19, 4096  ;;  %p1069_p1 = scmp.lt.s32.totalorder %s32_s19, %s32_s19 }
   0x6   :  { %p1065_p0 = scmp.ne.s32.totalorder %s32_s19, %s1064_s20  ;;  %p1070_p2 = scmp.lt.s32.totalorder %s1064_s20, %s1064_s20 }
   0x8   :  { %p1071_p3 = por %p1070_p2, %p1069_p1 }
   0xa   :  { %p1072_p4 = pnand %p1071_p3, %p1065_p0 }
   0xc   :  { %1075 = shalt.err (!%p1072_p4)
}
   0xd   :  { %s1165_s21 = smov 256   ;;  %s1166_s22 = smov 16  }
   0xe   :  { %37 = dma.hbm_to_vmem [thread:$0]  %s1259_s1, 4096, %s32_s19, [#allocation7], %s1165_s21, %s1165_s21, %s1166_s22  }
   0xf   :  { %s1167_s25 = smov [#allocation3]  }
  0x10   :  { %s19_s26 = sshll.u32 %s1167_s25, 4  ;;  %s20_s26 = int_to_ptr.vmem [resolvable:$true] %s19_s26 }
  0x11   :  { %s1084_s27 = scalar_lea.vmem %s20_s26, 256  ;;  %p1089_p6 = scmp.lt.s32.totalorder %s20_s26, %s20_s26 }
  0x12   :  { %p1085_p5 = scmp.ne.s32.totalorder %s20_s26, %s1084_s27  ;;  %p1090_p7 = scmp.lt.s32.totalorder %s1084_s27, %s1084_s27 }
  0x14   :  { %p1091_p8 = por %p1090_p7, %p1089_p6 }
  0x16   :  { %p1092_p9 = pnand %p1091_p8, %p1085_p5 }
  0x18   :  { %1095 = shalt.err (!%p1092_p9)
}
  0x19   :  { %s1168_s28 = smov 128   ;;  %s1169_s29 = smov 8  }
  0x1a   :  { %25 = dma.hbm_to_vmem [thread:$0]  %s1258_s0, 256, %s20_s26, [#allocation4], %s1168_s28, %s1168_s28, %s1169_s29  }
  0x1b   :  { %s1170_s1 = smov [#allocation8]   ;;  %s1171_s8 = smov [#allocation9]  }
  0x1c   :  { %s44_s7 = sshll.u32 %s1170_s1, 4  ;;  %s53_s9 = sshll.u32 %s1171_s8, 4  ;;  %s45_s7 = int_to_ptr.vmem [resolvable:$true] %s44_s7  ;;  %s54_s9 = int_to_ptr.vmem [resolvable:$true] %s53_s9 }
  0x1d   :  { %s1104_s10 = scalar_lea.vmem %s45_s7, 64  ;;  %p1109_p11 = scmp.lt.s32.totalorder %s45_s7, %s45_s7 }
  0x1e   :  { %p1105_p10 = scmp.ne.s32.totalorder %s45_s7, %s1104_s10  ;;  %p1110_p12 = scmp.lt.s32.totalorder %s1104_s10, %s1104_s10 }
  0x20   :  { %p1111_p13 = por %p1110_p12, %p1109_p11 }
  0x22   :  { %p1112_p0 = pnand %p1111_p13, %p1105_p10 }
  0x24   :  { %1115 = shalt.err (!%p1112_p0)
}
  0x25   :  { %47 = dma.hbm_to_vmem [thread:$0]  %s1260_s2, 64, %s45_s7, [#allocation7]  }
  0x26   :  { %s1124_s13 = scalar_lea.vmem %s54_s9, 4096  ;;  %p1129_p2 = scmp.lt.s32.totalorder %s54_s9, %s54_s9 }
  0x27   :  { %p1125_p1 = scmp.ne.s32.totalorder %s54_s9, %s1124_s13  ;;  %p1130_p3 = scmp.lt.s32.totalorder %s1124_s13, %s1124_s13 }
  0x29   :  { %p1131_p4 = por %p1130_p3, %p1129_p2 }
  0x2b   :  { %p1132_p5 = pnand %p1131_p4, %p1125_p1 }
  0x2d   :  { %1135 = shalt.err (!%p1132_p5)
}
  0x2e   :  { %s1172_s0 = smov 64   ;;  %s1173_s14 = smov 4  }
  0x2f   :  { %59 = dma.hbm_to_vmem [thread:$0]  %s1261_s3, 4096, %s54_s9, [#allocation10], %s1172_s0, %s1172_s0, %s1173_s14  }
  0x30   :  { %1156 = dma.done.wait [#allocation4], 256  }
  0x31   :  { %1157 = vsyncadd [#allocation4], 4294967040 }
  0x32   :  { %1158 = dma.done.wait [#allocation7], 4160  }
  0x33   :  { %1159 = vsyncadd [#allocation7], 4294963136 }
  0x34   :  { %1160 = dma.done.wait [#allocation10], 4096  }
  0x35   :  { %1161 = vsyncadd [#allocation10], 4294963200  ;;  %v1174_v0 = vmov 0   ;;  %v960_v1 = vld [vmem:[#allocation6 + $0xe4] ss:$16 sps:$4 sm:$0xff]   ;;  %v82_v34 = vld [vmem:[#allocation3 + $0x8] sm:$0xff] }
  0x36   :  { %330 = vmatprep.mubr.bf16.mxu0 %v1174_v0  ;;  %373 = vmatprep.mubr.bf16.mxu1 %v1174_v0  ;;  %v962_v2 = vld [vmem:[#allocation6 + $0xec] ss:$16 sps:$4 sm:$0xff]   ;;  %v964_v3 = vld [vmem:[#allocation6 + $0xe0] ss:$16 sps:$4 sm:$0xff]   ;;  %v965_v4 = vld [vmem:[#allocation6 + $0xe8] ss:$16 sps:$4 sm:$0xff]  }
  0x37   :  { %298 = vmatprep.subr.bf16.mxu0 %v960_v1  ;;  %341 = vmatprep.subr.bf16.mxu1 %v962_v2  ;;  %v966_v5 = vld [vmem:[#allocation6 + $0xc4] ss:$16 sps:$4 sm:$0xff]   ;;  %v968_v6 = vld [vmem:[#allocation6 + $0xcc] ss:$16 sps:$4 sm:$0xff]   ;;  %v970_v7 = vld [vmem:[#allocation6 + $0xc0] ss:$16 sps:$4 sm:$0xff]  }
  0x38   :  { %299 = vmatpush1.bf16.msra.mxu0 %v964_v3  ;;  %342 = vmatpush1.bf16.msra.mxu1 %v965_v4  ;;  %v971_v8 = vld [vmem:[#allocation6 + $0xc8] ss:$16 sps:$4 sm:$0xff]   ;;  %v972_v9 = vld [vmem:[#allocation6 + $0xa4] ss:$16 sps:$4 sm:$0xff]   ;;  %v974_v10 = vld [vmem:[#allocation6 + $0xac] ss:$16 sps:$4 sm:$0xff]   ;;  %v118_v4 = vlaneseq }
  0x39   :  { %300 = vmatprep.subr.bf16.mxu0 %v966_v5  ;;  %343 = vmatprep.subr.bf16.mxu1 %v968_v6  ;;  %v976_v11 = vld [vmem:[#allocation6 + $0xa0] ss:$16 sps:$4 sm:$0xff]   ;;  %v977_v12 = vld [vmem:[#allocation6 + $0xa8] ss:$16 sps:$4 sm:$0xff]   ;;  %v978_v13 = vld [vmem:[#allocation6 + $0x84] ss:$16 sps:$4 sm:$0xff]  }
  0x3a   :  { %v980_v14 = vld [vmem:[#allocation6 + $0x8c] ss:$16 sps:$4 sm:$0xff]   ;;  %v982_v15 = vld [vmem:[#allocation6 + $0x80] ss:$16 sps:$4 sm:$0xff]   ;;  %v983_v16 = vld [vmem:[#allocation6 + $0x88] ss:$16 sps:$4 sm:$0xff]  }
  0x3b   :  { %v984_v17 = vld [vmem:[#allocation6 + $0x64] ss:$16 sps:$4 sm:$0xff]   ;;  %v986_v18 = vld [vmem:[#allocation6 + $0x6c] ss:$16 sps:$4 sm:$0xff]   ;;  %v988_v19 = vld [vmem:[#allocation6 + $0x60] ss:$16 sps:$4 sm:$0xff]  }
  0x3c   :  { %301 = vmatpush1.bf16.msra.mxu0 %v970_v7  ;;  %344 = vmatpush1.bf16.msra.mxu1 %v971_v8  ;;  %v989_v20 = vld [vmem:[#allocation6 + $0x68] ss:$16 sps:$4 sm:$0xff]   ;;  %v990_v21 = vld [vmem:[#allocation6 + $0x44] ss:$16 sps:$4 sm:$0xff]   ;;  %v992_v22 = vld [vmem:[#allocation6 + $0x4c] ss:$16 sps:$4 sm:$0xff]  }
  0x3d   :  { %302 = vmatprep.subr.bf16.mxu0 %v972_v9  ;;  %345 = vmatprep.subr.bf16.mxu1 %v974_v10  ;;  %v994_v23 = vld [vmem:[#allocation6 + $0x40] ss:$16 sps:$4 sm:$0xff]   ;;  %v995_v24 = vld [vmem:[#allocation6 + $0x48] ss:$16 sps:$4 sm:$0xff]   ;;  %v996_v25 = vld [vmem:[#allocation6 + $0x24] ss:$16 sps:$4 sm:$0xff]  }
  0x3e   :  { %v998_v26 = vld [vmem:[#allocation6 + $0x2c] ss:$16 sps:$4 sm:$0xff]   ;;  %v1000_v27 = vld [vmem:[#allocation6 + $0x20] ss:$16 sps:$4 sm:$0xff]   ;;  %v1001_v28 = vld [vmem:[#allocation6 + $0x28] ss:$16 sps:$4 sm:$0xff]  }
  0x3f   :  { %v1002_v29 = vld [vmem:[#allocation6 + $0x4] ss:$16 sps:$4 sm:$0xff]   ;;  %v1004_v30 = vld [vmem:[#allocation6 + $0xc] ss:$16 sps:$4 sm:$0xff]   ;;  %v1006_v31 = vld [vmem:[#allocation6] ss:$16 sps:$4 sm:$0xff]  }
  0x40   :  { %303 = vmatpush1.bf16.msra.mxu0 %v976_v11  ;;  %346 = vmatpush1.bf16.msra.mxu1 %v977_v12  ;;  %v1007_v32 = vld [vmem:[#allocation6 + $0x8] ss:$16 sps:$4 sm:$0xff]   ;;  %v81_v33 = vld [vmem:[#allocation3] sm:$0xff]  ;;  %v1008_v36 = vld [vmem:[#allocation9 + $0x78] sm:$0xff]   ;;  %v119_v5 = vshrl.u32 %v118_v4, 7  ;;  %s1175_s17 = smov [#allocation11]  }
  0x41   :  { %304 = vmatprep.subr.bf16.mxu0 %v978_v13  ;;  %347 = vmatprep.subr.bf16.mxu1 %v980_v14  ;;  %v83_v35 = vpack.c.bf16 %v82_v34, %v81_v33  ;;  %v1009_v37 = vld [vmem:[#allocation9 + $0xf8] sm:$0xff]   ;;  %v1012_v40 = vld [vmem:[#allocation9 + $0x70] sm:$0xff]   ;;  %v1016_v44 = vld [vmem:[#allocation9 + $0x68] sm:$0xff]   ;;  %s825_s18 = sshll.u32 %s1175_s17, 4  ;;  %s826_s18 = int_to_ptr.vmem [resolvable:$true] %s825_s18 }
  0x42   :  { %v1010_v38 = vld [vmem:[#allocation9 + $0x38] sm:$0xff]   ;;  %v1013_v41 = vld [vmem:[#allocation9 + $0xf0] sm:$0xff]   ;;  %v1017_v45 = vld [vmem:[#allocation9 + $0xe8] sm:$0xff]   ;;  %v120_v6 = vsub.s32 0, %v119_v5  ;;  %v128_v7 = vsub.s32 2, %v119_v5  ;;  %v124_v9 = vsub.s32 1, %v119_v5  ;;  %p1141_p7 = scmp.lt.s32.totalorder %s826_s18, %s826_s18 }
  0x43   :  { %v1011_v39 = vld [vmem:[#allocation9 + $0xb8] sm:$0xff]   ;;  %v1014_v42 = vld [vmem:[#allocation9 + $0x30] sm:$0xff]   ;;  %v1018_v46 = vld [vmem:[#allocation9 + $0x28] sm:$0xff]   ;;  %v132_v10 = vsub.s32 3, %v119_v5  ;;  %s1136_s19 = scalar_lea.vmem %s826_s18, 256 }
  0x44   :  { %305 = vmatpush1.bf16.msra.mxu0 %v982_v15  ;;  %348 = vmatpush1.bf16.msra.mxu1 %v983_v16  ;;  %v1015_v43 = vld [vmem:[#allocation9 + $0xb0] sm:$0xff]   ;;  %v1019_v47 = vld [vmem:[#allocation9 + $0xa8] sm:$0xff]   ;;  %v1020_v48 = vld [vmem:[#allocation9 + $0x60] sm:$0xff]   ;;  %p1137_p6 = scmp.ne.s32.totalorder %s826_s18, %s1136_s19  ;;  %p1142_p8 = scmp.lt.s32.totalorder %s1136_s19, %s1136_s19 }
  0x45   :  { %306 = vmatprep.subr.bf16.mxu0 %v984_v17  ;;  %349 = vmatprep.subr.bf16.mxu1 %v986_v18  ;;  %v1021_v49 = vld [vmem:[#allocation9 + $0xe0] sm:$0xff]   ;;  %v1024_v52 = vld [vmem:[#allocation9 + $0x58] sm:$0xff]   ;;  %v1028_v56 = vld [vmem:[#allocation9 + $0x50] sm:$0xff]  }
  0x46   :  { %v1022_v50 = vld [vmem:[#allocation9 + $0x20] sm:$0xff]   ;;  %v1025_v53 = vld [vmem:[#allocation9 + $0xd8] sm:$0xff]   ;;  %v1029_v57 = vld [vmem:[#allocation9 + $0xd0] sm:$0xff]   ;;  %p1143_p9 = por %p1142_p8, %p1141_p7 }
  0x47   :  { %v1023_v51 = vld [vmem:[#allocation9 + $0xa0] sm:$0xff]   ;;  %v1026_v54 = vld [vmem:[#allocation9 + $0x18] sm:$0xff]   ;;  %v1030_v58 = vld [vmem:[#allocation9 + $0x10] sm:$0xff]  }
  0x48   :  { %307 = vmatpush1.bf16.msra.mxu0 %v988_v19  ;;  %350 = vmatpush1.bf16.msra.mxu1 %v989_v20  ;;  %v1027_v55 = vld [vmem:[#allocation9 + $0x98] sm:$0xff]   ;;  %v1031_v59 = vld [vmem:[#allocation9 + $0x90] sm:$0xff]   ;;  %v1032_v60 = vld [vmem:[#allocation9 + $0x48] sm:$0xff]   ;;  %p1144_p10 = pnand %p1143_p9, %p1137_p6 }
  0x49   :  { %308 = vmatprep.subr.bf16.mxu0 %v990_v21  ;;  %351 = vmatprep.subr.bf16.mxu1 %v992_v22  ;;  %v1033_v61 = vld [vmem:[#allocation9 + $0xc8] sm:$0xff]   ;;  %v1036_v0 = vld [vmem:[#allocation9 + $0x40] sm:$0xff]   ;;  %v116_v8 = vld [vmem:[#allocation8] sm:$0xf] }
  0x4a   :  { %v1034_v62 = vld [vmem:[#allocation9 + $0x8] sm:$0xff]   ;;  %v1037_v1 = vld [vmem:[#allocation9 + $0xc0] sm:$0xff]   ;;  %v121_v11 = vrot.slane %v116_v8, %v120_v6  ;;  %v129_v12 = vrot.slane %v116_v8, %v128_v7  ;;  %v125_v13 = vrot.slane %v116_v8, %v124_v9  ;;  %v133_v14 = vrot.slane %v116_v8, %v132_v10 }
  0x4b   :  { %v1035_v63 = vld [vmem:[#allocation9 + $0x88] sm:$0xff]   ;;  %v1038_v2 = vld [vmem:[#allocation9] sm:$0xff]  }
  0x4c   :  { %309 = vmatpush1.bf16.msra.mxu0 %v994_v23  ;;  %352 = vmatpush1.bf16.msra.mxu1 %v995_v24  ;;  %v1039_v3 = vld [vmem:[#allocation9 + $0x80] sm:$0xff]  }
  0x4d   :  { %310 = vmatprep.subr.bf16.mxu0 %v996_v25  ;;  %353 = vmatprep.subr.bf16.mxu1 %v998_v26 }
  0x50   :  { %311 = vmatpush1.bf16.msra.mxu0 %v1000_v27  ;;  %354 = vmatpush1.bf16.msra.mxu1 %v1001_v28 }
  0x51   :  { %312 = vmatprep.subr.bf16.mxu0 %v1002_v29  ;;  %355 = vmatprep.subr.bf16.mxu1 %v1004_v30 }
  0x54   :  { %313 = vmatpush1.bf16.msra.mxu0 %v1006_v31  ;;  %356 = vmatpush1.bf16.msra.mxu1 %v1007_v32 }
  0x55   :  { %904 = vmatprep.subr.bf16.mxu0 %v1008_v36  ;;  %926 = vmatprep.subr.bf16.mxu1 %v1009_v37 }
  0x57   :  { %331 = vmatmul.mubr.bf16.vlgmr.msra.gmra.mxu0 %v83_v35  ;;  %374 = vmatmul.mubr.bf16.vlgmr.msra.gmra.mxu1 %v83_v35 }
  0x58   :  { %905 = vmatpush3.bf16.msra.mxu0 %v1010_v38  ;;  %927 = vmatpush3.bf16.msra.mxu1 %v1011_v39 }
  0x59   :  { %906 = vmatprep.subr.bf16.mxu0 %v1012_v40  ;;  %928 = vmatprep.subr.bf16.mxu1 %v1013_v41 }
  0x5c   :  { %907 = vmatpush3.bf16.msra.mxu0 %v1014_v42  ;;  %929 = vmatpush3.bf16.msra.mxu1 %v1015_v43 }
  0x5d   :  { %908 = vmatprep.subr.bf16.mxu0 %v1016_v44  ;;  %930 = vmatprep.subr.bf16.mxu1 %v1017_v45 }
  0x60   :  { %909 = vmatpush3.bf16.msra.mxu0 %v1018_v46  ;;  %931 = vmatpush3.bf16.msra.mxu1 %v1019_v47 }
  0x61   :  { %910 = vmatprep.subr.bf16.mxu0 %v1020_v48  ;;  %932 = vmatprep.subr.bf16.mxu1 %v1021_v49 }
  0x64   :  { %911 = vmatpush3.bf16.msra.mxu0 %v1022_v50  ;;  %933 = vmatpush3.bf16.msra.mxu1 %v1023_v51 }
  0x65   :  { %912 = vmatprep.subr.bf16.mxu0 %v1024_v52  ;;  %934 = vmatprep.subr.bf16.mxu1 %v1025_v53 }
  0x68   :  { %913 = vmatpush3.bf16.msra.mxu0 %v1026_v54  ;;  %935 = vmatpush3.bf16.msra.mxu1 %v1027_v55 }
  0x69   :  { %914 = vmatprep.subr.bf16.mxu0 %v1028_v56  ;;  %936 = vmatprep.subr.bf16.mxu1 %v1029_v57 }
  0x6c   :  { %915 = vmatpush3.bf16.msra.mxu0 %v1030_v58  ;;  %937 = vmatpush3.bf16.msra.mxu1 %v1031_v59 }
  0x6d   :  { %916 = vmatprep.subr.bf16.mxu0 %v1032_v60  ;;  %938 = vmatprep.subr.bf16.mxu1 %v1033_v61 }
  0x70   :  { %917 = vmatpush3.bf16.msra.mxu0 %v1034_v62  ;;  %939 = vmatpush3.bf16.msra.mxu1 %v1035_v63 }
  0x71   :  { %918 = vmatprep.subr.bf16.mxu0 %v1036_v0  ;;  %940 = vmatprep.subr.bf16.mxu1 %v1037_v1 }
  0x74   :  { %919 = vmatpush3.bf16.msra.mxu0 %v1038_v2  ;;  %941 = vmatpush3.bf16.msra.mxu1 %v1039_v3 }
 0x117   :  { %v332_v15 = vpop.f32.mrf.mxu0  ;;  %v375_v16 = vpop.f32.mrf.mxu1 }
 0x118   :  { %v1221_v17 = vadd.f32 %v332_v15, %v121_v11  ;;  %v1223_v18 = vadd.f32 %v375_v16, %v129_v12 }
 0x119   :  { %v334_v19 = vpop.f32.mrf.mxu0  ;;  %v377_v20 = vpop.f32.mrf.mxu1 }
 0x11a   :  { %v392_v21 = vmul.f32 0.044715, %v1221_v17  ;;  %v394_v22 = vmul.f32 0.044715, %v1223_v18  ;;  %v335_v23 = vadd.f32 %v334_v19, %v125_v13  ;;  %v1227_v24 = vadd.f32 %v377_v20, %v133_v14 }
 0x11b   :  { %v336_v25 = vpop.f32.mrf.mxu0  ;;  %v379_v26 = vpop.f32.mrf.mxu1  ;;  %v384_v15 = vmul.f32 0.5, %v1221_v17 }
 0x11c   :  { %v400_v27 = vmul.f32 %v392_v21, %v1221_v17  ;;  %v402_v28 = vmul.f32 %v394_v22, %v1223_v18  ;;  %v393_v29 = vmul.f32 0.044715, %v335_v23  ;;  %v395_v30 = vmul.f32 0.044715, %v1227_v24 }
 0x11d   :  { %v337_v31 = vadd.f32 %v336_v25, %v121_v11  ;;  %v1232_v32 = vadd.f32 %v379_v26, %v129_v12  ;;  %v338_v33 = vpop.f32.mrf.mxu0  ;;  %v381_v34 = vpop.f32.mrf.mxu1 }
 0x11e   :  { %v408_v35 = vmul.f32 %v400_v27, %v1221_v17  ;;  %v410_v36 = vmul.f32 %v402_v28, %v1223_v18  ;;  %v401_v37 = vmul.f32 %v393_v29, %v335_v23  ;;  %v403_v38 = vmul.f32 %v395_v30, %v1227_v24 }
 0x11f   :  { %v396_v39 = vmul.f32 0.044715, %v337_v31  ;;  %v398_v40 = vmul.f32 0.044715, %v1232_v32  ;;  %v339_v41 = vadd.f32 %v338_v33, %v125_v13  ;;  %v382_v42 = vadd.f32 %v381_v34, %v133_v14 }
 0x120   :  { %v416_v43 = vadd.f32 %v408_v35, %v1221_v17  ;;  %v418_v44 = vadd.f32 %v410_v36, %v1223_v18  ;;  %v409_v45 = vmul.f32 %v401_v37, %v335_v23  ;;  %v411_v46 = vmul.f32 %v403_v38, %v1227_v24 }
 0x121   :  { %v404_v47 = vmul.f32 %v396_v39, %v337_v31  ;;  %v406_v48 = vmul.f32 %v398_v40, %v1232_v32  ;;  %v397_v49 = vmul.f32 0.044715, %v339_v41  ;;  %v399_v50 = vmul.f32 0.044715, %v382_v42 }
 0x122   :  { %v424_v51 = vmul.f32 0.7978846, %v416_v43  ;;  %v426_v52 = vmul.f32 0.7978846, %v418_v44  ;;  %v417_v53 = vadd.f32 %v409_v45, %v335_v23  ;;  %v419_v59 = vadd.f32 %v411_v46, %v1227_v24 }
 0x123   :  { %v412_v54 = vmul.f32 %v404_v47, %v337_v31  ;;  %v414_v55 = vmul.f32 %v406_v48, %v1232_v32  ;;  %v405_v56 = vmul.f32 %v397_v49, %v339_v41  ;;  %v407_v57 = vmul.f32 %v399_v50, %v382_v42  ;;  %v903_v50 = vld [vmem:[%s1262_s4] ss:$0 sm:$0xff] }
 0x124   :  { %v425_v58 = vmul.f32 0.7978846, %v417_v53  ;;  %1040 = vtanh.f32 %v424_v51  ;;  %v427_v0 = vmul.f32 0.7978846, %v419_v59  ;;  %v385_v13 = vmul.f32 0.5, %v335_v23 }
 0x125   :  { %v420_v60 = vadd.f32 %v412_v54, %v337_v31  ;;  %v422_v61 = vadd.f32 %v414_v55, %v1232_v32  ;;  %v413_v62 = vmul.f32 %v405_v56, %v339_v41  ;;  %1042 = vtanh.f32 %v426_v52 }
 0x126   :  { %v415_v63 = vmul.f32 %v407_v57, %v382_v42  ;;  %1044 = vtanh.f32 %v425_v58  ;;  %v388_v21 = vmul.f32 0.5, %v337_v31  ;;  %v389_v27 = vmul.f32 0.5, %v339_v41 }
 0x127   :  { %v428_v1 = vmul.f32 0.7978846, %v420_v60  ;;  %v430_v2 = vmul.f32 0.7978846, %v422_v61  ;;  %v421_v3 = vadd.f32 %v413_v62, %v339_v41  ;;  %1046 = vtanh.f32 %v427_v0 }
 0x128   :  { %v423_v4 = vadd.f32 %v415_v63, %v382_v42  ;;  %v390_v29 = vmul.f32 0.5, %v1232_v32  ;;  %v387_v33 = vmul.f32 0.5, %v1227_v24  ;;  %v391_v34 = vmul.f32 0.5, %v382_v42 }
 0x129   :  { %1048 = vtanh.f32 %v428_v1  ;;  %v429_v5 = vmul.f32 0.7978846, %v421_v3  ;;  %v386_v17 = vmul.f32 0.5, %v1223_v18 }
 0x12a   :  { %1050 = vtanh.f32 %v430_v2  ;;  %v431_v6 = vmul.f32 0.7978846, %v423_v4 }
 0x12b   :  { %1052 = vtanh.f32 %v429_v5 }
 0x12c   :  { %1054 = vtanh.f32 %v431_v6 }
 0x131   :  { %v1041_v7 = vpop.eup %1040 }
 0x132   :  { %v1043_v8 = vpop.eup %1042  ;;  %v440_v22 = vadd.f32 1.0, %v1041_v7 }
 0x133   :  { %v1045_v9 = vpop.eup %1044  ;;  %v442_v30 = vadd.f32 1.0, %v1043_v8 }
 0x134   :  { %v1047_v10 = vpop.eup %1046  ;;  %v441_v14 = vadd.f32 1.0, %v1045_v9  ;;  %v448_v40 = vmul.f32 %v440_v22, %v384_v15 }
 0x135   :  { %v443_v20 = vadd.f32 1.0, %v1047_v10  ;;  %v450_v44 = vmul.f32 %v442_v30, %v386_v17 }
 0x136   :  { %v1049_v11 = vpop.eup %1048  ;;  %v449_v36 = vmul.f32 %v441_v14, %v385_v13 }
 0x137   :  { %v1051_v12 = vpop.eup %1050  ;;  %v444_v16 = vadd.f32 1.0, %v1049_v11  ;;  %v451_v39 = vmul.f32 %v443_v20, %v387_v33 }
 0x138   :  { %v1053_v19 = vpop.eup %1052  ;;  %v446_v25 = vadd.f32 1.0, %v1051_v12 }
 0x139   :  { %v1055_v26 = vpop.eup %1054  ;;  %v445_v28 = vadd.f32 1.0, %v1053_v19  ;;  %v452_v23 = vmul.f32 %v444_v16, %v388_v21 }
 0x13a   :  { %v447_v35 = vadd.f32 1.0, %v1055_v26  ;;  %v454_v38 = vmul.f32 %v446_v25, %v390_v29 }
 0x13b   :  { %v453_v37 = vmul.f32 %v445_v28, %v389_v27  ;;  %v458_v45 = vpack.c.bf16 %v452_v23, %v448_v40 }
 0x13c   :  { %v455_v31 = vmul.f32 %v447_v35, %v391_v34  ;;  %v460_v32 = vpack.c.bf16 %v454_v38, %v450_v44 }
 0x13d   :  { %v459_v43 = vpack.c.bf16 %v453_v37, %v449_v36 }
 0x13e   :  { %v461_v41 = vpack.c.bf16 %v455_v31, %v451_v39 }
 0x13f   :  { %750 = vmatprep.mubr.bf16.mxu0 %v459_v43 }
 0x140   :  { %791 = vmatprep.mubr.bf16.mxu1 %v461_v41  ;;  %751 = vmatmul.mubr.bf16.vlgmr.msra.gmra.mxu0 %v458_v45 }
 0x141   :  { %792 = vmatmul.mubr.bf16.vlgmr.msra.gmra.mxu1 %v460_v32 }
 0x200   :  { %v920_v24 = vpop.f32.mrf.mxu0 }
 0x201   :  { %v942_v42 = vpop.f32.mrf.mxu1 }
 0x202   :  { %v921_v46 = vpop.f32.mrf.mxu0 }
 0x203   :  { %v922_v47 = vadd.f32 %v921_v46, %v920_v24  ;;  %v943_v48 = vpop.f32.mrf.mxu1 }
 0x204   :  { %v944_v49 = vadd.f32 %v943_v48, %v942_v42  ;;  %v923_v18 = vpop.f32.mrf.mxu0 }
 0x205   :  { %v945_v51 = vpop.f32.mrf.mxu1 }
 0x206   :  { %v794_v52 = vadd.f32 %v944_v49, %v922_v47  ;;  %v924_v53 = vpop.f32.mrf.mxu0 }
 0x207   :  { %v925_v54 = vadd.f32 %v924_v53, %v923_v18  ;;  %v946_v55 = vpop.f32.mrf.mxu1 }
 0x208   :  { %v816_v56 = vadd.f32 %v903_v50, %v794_v52  ;;  %v947_v57 = vadd.f32 %v946_v55, %v945_v51 }
 0x20a   :  { %818 = vst [vmem:[#allocation11] sm:$0xff] %v816_v56  ;;  %v797_v58 = vadd.f32 %v947_v57, %v925_v54 }
 0x20c   :  { %v817_v59 = vadd.f32 %v903_v50, %v797_v58 }
 0x20e   :  { %819 = vst [vmem:[#allocation11 + $0x8] sm:$0xff] %v817_v59 }
 0x20f   :  { %1147 = shalt.err (!%p1144_p10)
}
 0x210   :  { %831 = dma.vmem_to_hbm [thread:$0]  %s826_s18, 256, %s1263_s5, [#allocation5], %s1168_s28, %s1168_s28, %s1169_s29  }
 0x211   :  { %1162 = dma.done.wait [#allocation5], 256  }
 0x212   :  { %1163 = vsyncadd [#allocation5], 4294967040 }
 0x213   :  { %835 = vsyncpa [#allocation4], 1 }
 0x214   :  { %836 = vsyncpa [#allocation7], 1 }
 0x215   :  { %837 = vsyncpa [#allocation10], 1 }
 0x216   :  { %838 = vsyncpa [#allocation5], 1 }

</bundles_post_ra>
